<compile_context>
chip_gen: v7x
topology: tpu7x:2x2x1
jax: 0.10.0
libtpu: 0.0.40
codegen_flags: <defaults>
</compile_context>

<pallas_src>
import functools

import jax
import jax.numpy as jnp
from jax import lax
from jax.experimental import pallas as pl
from jax.experimental.pallas import tpu as pltpu


def _recip(x):
    """EUP reciprocal (vrcp) + one Newton-Raphson refinement.

    approx vrcp alone is ~1e-3..1e-4 relative error; one Newton step brings it
    to ~1e-7 while keeping the divide off the VPU (EUP is a separate slot)."""
    r = pl.reciprocal(x, approx=True)
    return r * (2.0 - x * r)


def _eye(n, dtype):
    """In-kernel identity matrix via 2-D iota comparison."""
    r = lax.broadcasted_iota(jnp.int32, (n, n), 0)
    c = lax.broadcasted_iota(jnp.int32, (n, n), 1)
    return (r == c).astype(dtype)


def _transpose_mxu(x):
    """Exact 2-D transpose via an identity matmul (NT dot_general on the MXU).

    out[i, j] = sum_k eye[i, k] * x[j, k] = x[j, i]; every output element is
    1.0 * x (exact).  Avoids relying on XLU transpose lowering for shapes whose
    minor dims are not (8,128)-aligned (K ~ 10 classes, B ~ 8-32 batch)."""
    n = x.shape[1]
    return lax.dot_general(_eye(n, x.dtype), x,
                           dimension_numbers=(((1,), (1,)), ((), ())),
                           preferred_element_type=jnp.float32)


def _sinkhorn_kernel(queue_ref, out_batch_ref, out_rows_ref, out_cols_ref,
                     *, num_iters, epsilon, delta, batch_size):
    N, K = queue_ref.shape
    B = batch_size

    # Native (N, K) queue -> lane-dense (K, N) working layout, in-kernel.
    x = _transpose_mxu(queue_ref[...].astype(jnp.float32))          # (K, N)

    # softmax(logit_queue / eps, dim=1)  ==  softmax over axis 0 here.
    x = x * (1.0 / epsilon)
    x = x - jnp.max(x, axis=0, keepdims=True)
    e = jnp.exp(x)
    q = e * _recip(jnp.sum(e, axis=0, keepdims=True))               # (K, N)

    inv_k = 1.0 / K
    inv_n = 1.0 / N

    # torch: Q /= sum_Q.  With delta == 0 this full-matrix scale cancels
    # exactly inside the first row normalization, so skip the (K, N) broadcast
    # multiply; only the *reported* first-iteration row sums need 1/sum_Q.
    fold_global = (delta == 0.0) and (num_iters > 0)
    need_inv_total = (not fold_global) or (num_iters == 1)
    if need_inv_total:
        inv_total = 1.0 / jnp.sum(q)        # single exact scalar divide
    if not fold_global:
        q = q * inv_total

    rows = jnp.zeros((K, 1), jnp.float32)
    cols = jnp.zeros((1, N), jnp.float32)
    for it in range(num_iters):             # static unroll (default 3)
        raw_rows = jnp.sum(q, axis=1, keepdims=True)                # (K, 1)
        if it == 0 and fold_global:
            # Reference sum_of_rows carries the folded 1/sum_Q factor; only
            # materialize it if this iteration's value is actually returned.
            rows = raw_rows * inv_total if num_iters == 1 else raw_rows
            q = q * (_recip(raw_rows) * inv_k)   # == Q/sum_Q/rows/K  (delta=0)
        else:
            rows = raw_rows + delta
            q = q * (_recip(rows) * inv_k)
        cols = jnp.sum(q, axis=0, keepdims=True)                    # (1, N)
        if it < num_iters - 1:
            q = q * (_recip(cols) * inv_n)
        # Last iteration: "Q /= cols; Q /= N; Q *= N" only matters for the
        # emitted batch slice -> applied below on the (K, B) slab only.

    if num_iters > 0:
        slab = q[:, :B] * _recip(cols[:, :B])                       # (K, B)
    else:
        # torch would return undefined row/col sums here; we return zeros and
        # the normalized Q * N slice.
        slab = q[:, :B] * float(N)

    out_batch_ref[...] = _transpose_mxu(slab)                       # (B, K)
    out_rows_ref[...] = rows                                        # (K, 1)
    out_cols_ref[...] = cols                                        # (1, N)


def sinkhorn_knopp(logits, logit_queue, *, num_iters=3, epsilon=0.05, delta=0.0):
    """Mirror of SinkhornKnopp.forward(logits): only logits.shape[0] is used;
    all math happens on the (queue_len, classes_n) logit_queue buffer."""
    batch_size = int(logits.shape[0])
    N, K = (int(s) for s in logit_queue.shape)
    assert batch_size <= N, "batch must fit in the queue (matches torch slicing)"

    # --- single-full-block size guards --------------------------------------
    # vreg budget: the unrolled loop keeps ~3 live (K, N) f32 copies resident;
    # each is ceil(K/8)*ceil(N/128) vregs.  Past ~48 the kernel flips from
    # VPU-bound to spill-bound.
    vregs_per_copy = -(-K // 8) * -(-N // 128)
    assert vregs_per_copy * 3 <= 48, (
        f"queue too large for the single-block Sinkhorn kernel "
        f"({vregs_per_copy} vregs per live copy)")
    # TODO(synk): tiled two-pass variant (grid over N) for queue_len > ~2048.

    # VMEM budget, generation-aware: v7x has 64 MiB physical (half of v5e/v6e)
    # and v5e's scoped default is 16 MiB; input/output blocks are
    # double-buffered by BlockSpec.
    try:
        vmem_physical = int(pltpu.get_tpu_info().vmem_capacity_bytes)
    except Exception:
        vmem_physical = 64 * 1024 * 1024          # assume the smallest (v7x)
    scoped_limit = min(16 * 1024 * 1024, vmem_physical // 4)

    def _pad(v, m):
        return -(-v // m) * m

    in_tile = _pad(N, 8) * _pad(K, 128) * 4
    out_tiles = (_pad(batch_size, 8) * _pad(K, 128)
                 + _pad(K, 8) * 128 + 8 * _pad(N, 128)) * 4
    work = 6 * _pad(K, 8) * _pad(N, 128) * 4      # live (K, N) f32 temporaries
    est_vmem = 2 * in_tile + 2 * out_tiles + work
    assert est_vmem <= scoped_limit, (
        f"estimated VMEM {est_vmem}B exceeds conservative scoped limit "
        f"{scoped_limit}B; tile the kernel or raise vmem_limit_bytes")

    kernel = functools.partial(
        _sinkhorn_kernel, num_iters=num_iters, epsilon=epsilon, delta=delta,
        batch_size=batch_size)

    out_batch, out_rows, out_cols = pl.pallas_call(
        kernel,
        grid=(1,),
        in_specs=[pl.BlockSpec((N, K), lambda i: (0, 0))],
        out_specs=(pl.BlockSpec((batch_size, K), lambda i: (0, 0)),
                   pl.BlockSpec((K, 1), lambda i: (0, 0)),
                   pl.BlockSpec((1, N), lambda i: (0, 0))),
        out_shape=(jax.ShapeDtypeStruct((batch_size, K), jnp.float32),
                   jax.ShapeDtypeStruct((K, 1), jnp.float32),
                   jax.ShapeDtypeStruct((1, N), jnp.float32)),
        compiler_params=pltpu.CompilerParams(
            dimension_semantics=("arbitrary",)),
    )(logit_queue)

    # torch: batch_assignments (B, K), sum_of_rows.squeeze() (K,),
    # sum_of_cols.squeeze() (N,).  The squeezes are free reshapes (no transposes
    # remain in the wrapper).
    return out_batch, out_rows[:, 0], out_cols[0]


def _reference(logits, queue, num_iters=3, epsilon=0.05, delta=0.0):
    """Pure-JAX transcription of the PyTorch forward (verification only)."""
    B = logits.shape[0]
    Q = jax.nn.softmax(queue / epsilon, axis=1).T        # (K, N)
    K, N = Q.shape
    Q = Q / jnp.sum(Q)
    sr = sc = None
    for _ in range(num_iters):
        sr = jnp.sum(Q, axis=1, keepdims=True) + delta
        Q = Q / sr / K
        sc = jnp.sum(Q, axis=0, keepdims=True)
        Q = Q / sc / N
    Q = Q * N
    return Q.T[:B, :], sr.squeeze(), sc.squeeze()


def _run_case(queue_len, classes_n, batch, seed, num_iters=3, delta=0.0):
    key = jax.random.PRNGKey(seed)
    k1, k2 = jax.random.split(key)
    logits = jax.random.normal(k1, (batch, classes_n), dtype=jnp.float32)
    logit_queue = jax.random.normal(k2, (queue_len, classes_n), dtype=jnp.float32)

    ba, sr, sc = sinkhorn_knopp(logits, logit_queue,
                                num_iters=num_iters, delta=delta)
    jax.block_until_ready((ba, sr, sc))

    ba_ref, sr_ref, sc_ref = _reference(logits, logit_queue,
                                        num_iters=num_iters, delta=delta)
    assert ba.shape == (batch, classes_n)
    assert sr.shape == (classes_n,)
    assert sc.shape == (queue_len,)
    assert jnp.allclose(ba, ba_ref, atol=1e-5, rtol=1e-5)
    assert jnp.allclose(sr, sr_ref, atol=1e-5, rtol=1e-5)
    assert jnp.allclose(sc, sc_ref, atol=1e-5, rtol=1e-5)


if __name__ == "__main__":
    # Small deterministic problem.
    _run_case(queue_len=128, classes_n=16, batch=8, seed=0)
    # Module default shapes (queue_len=1024, classes_n=10).
    _run_case(queue_len=1024, classes_n=10, batch=32, seed=0)
    # Exercise the num_iters==1 path of the delta==0 sum_Q fold.
    _run_case(queue_len=1024, classes_n=10, batch=32, seed=1, num_iters=1)
    # Exercise the delta != 0 (non-folded) path.
    _run_case(queue_len=256, classes_n=10, batch=16, seed=2, delta=0.01)
    print("KERNEL_OK")
</pallas_src>

<mosaic_0001>
module attributes {stable_mosaic.version = 11 : i64} {
  func.func @_sinkhorn_kernel(%arg0: i32, %arg1: memref<128x16xf32, #tpu.memory_space<vmem>>, %arg2: memref<8x16xf32, #tpu.memory_space<vmem>>, %arg3: memref<16x1xf32, #tpu.memory_space<vmem>>, %arg4: memref<1x128xf32, #tpu.memory_space<vmem>>) attributes {dimension_semantics = [#tpu.dimension_semantics<arbitrary>], iteration_bounds = array<i64: 1>, scalar_prefetch = 0 : i64, scratch_operands = 0 : i64, tpu.core_type = #tpu.core_type<tc>, window_params = [{pipeline_mode = #tpu.pipeline_mode<synchronous>, transform_indices = @transform_0, window_bounds = array<i64: 128, 16>}, {pipeline_mode = #tpu.pipeline_mode<synchronous>, transform_indices = @transform_1, window_bounds = array<i64: 8, 16>}, {pipeline_mode = #tpu.pipeline_mode<synchronous>, transform_indices = @transform_2, window_bounds = array<i64: 16, 1>}, {pipeline_mode = #tpu.pipeline_mode<synchronous>, transform_indices = @transform_3, window_bounds = array<i64: 1, 128>}]} {
    %c0 = arith.constant 0 : index
    %c0_0 = arith.constant 0 : index
    %0 = vector.load %arg1[%c0, %c0_0] : memref<128x16xf32, #tpu.memory_space<vmem>>, vector<128x16xf32>
    %1 = tpu.iota {dimensions = array<i32: 0>} : vector<16x16xi32>
    %2 = tpu.iota {dimensions = array<i32: 1>} : vector<16x16xi32>
    %3 = arith.cmpi eq, %1, %2 : vector<16x16xi32>
    %4 = arith.extui %3 : vector<16x16xi1> to vector<16x16xi32>
    %5 = arith.sitofp %4 : vector<16x16xi32> to vector<16x16xf32>
    %cst = arith.constant dense<0.000000e+00> : vector<16x128xf32>
    %6 = tpu.matmul %5, %0, %cst {dimension_numbers = #tpu.dot_dimension_numbers<[1], [1], [0], [0], [0, 0, 1, 0], [], []>} : vector<16x16xf32>, vector<128x16xf32>, vector<16x128xf32> -> vector<16x128xf32>
    %cst_1 = arith.constant 2.000000e+01 : f32
    %7 = vector.broadcast %cst_1 : f32 to vector<16x128xf32>
    %8 = arith.mulf %6, %7 : vector<16x128xf32>
    %cst_2 = arith.constant dense<0xFF800000> : vector<128xf32>
    %9 = vector.multi_reduction <maximumf>, %8, %cst_2 [0] : vector<16x128xf32> to vector<128xf32>
    %10 = vector.shape_cast %9 : vector<128xf32> to vector<1x128xf32>
    %11 = vector.broadcast %10 : vector<1x128xf32> to vector<16x128xf32>
    %12 = arith.subf %8, %11 : vector<16x128xf32>
    %13 = math.exp %12 : vector<16x128xf32>
    %cst_3 = arith.constant dense<0.000000e+00> : vector<128xf32>
    %14 = vector.multi_reduction <add>, %13, %cst_3 [0] : vector<16x128xf32> to vector<128xf32>
    %15 = vector.shape_cast %14 : vector<128xf32> to vector<1x128xf32>
    %16 = tpu.reciprocal %15 {approx = true} : vector<1x128xf32> -> vector<1x128xf32>
    %17 = arith.mulf %15, %16 : vector<1x128xf32>
    %cst_4 = arith.constant 2.000000e+00 : f32
    %18 = vector.broadcast %cst_4 : f32 to vector<1x128xf32>
    %19 = arith.subf %18, %17 : vector<1x128xf32>
    %20 = arith.mulf %16, %19 : vector<1x128xf32>
    %21 = vector.broadcast %20 : vector<1x128xf32> to vector<16x128xf32>
    %22 = arith.mulf %13, %21 : vector<16x128xf32>
    %cst_5 = arith.constant dense<0.000000e+00> : vector<16xf32>
    %23 = vector.multi_reduction <add>, %22, %cst_5 [1] : vector<16x128xf32> to vector<16xf32>
    %24 = vector.shape_cast %23 : vector<16xf32> to vector<16x1xf32>
    %25 = tpu.reciprocal %24 {approx = true} : vector<16x1xf32> -> vector<16x1xf32>
    %26 = arith.mulf %24, %25 : vector<16x1xf32>
    %cst_6 = arith.constant 2.000000e+00 : f32
    %27 = vector.broadcast %cst_6 : f32 to vector<16x1xf32>
    %28 = arith.subf %27, %26 : vector<16x1xf32>
    %29 = arith.mulf %25, %28 : vector<16x1xf32>
    %cst_7 = arith.constant 6.250000e-02 : f32
    %30 = vector.broadcast %cst_7 : f32 to vector<16x1xf32>
    %31 = arith.mulf %29, %30 : vector<16x1xf32>
    %32 = vector.broadcast %31 : vector<16x1xf32> to vector<16x128xf32>
    %33 = arith.mulf %22, %32 : vector<16x128xf32>
    %cst_8 = arith.constant dense<0.000000e+00> : vector<128xf32>
    %34 = vector.multi_reduction <add>, %33, %cst_8 [0] : vector<16x128xf32> to vector<128xf32>
    %35 = vector.shape_cast %34 : vector<128xf32> to vector<1x128xf32>
    %36 = tpu.reciprocal %35 {approx = true} : vector<1x128xf32> -> vector<1x128xf32>
    %37 = arith.mulf %35, %36 : vector<1x128xf32>
    %cst_9 = arith.constant 2.000000e+00 : f32
    %38 = vector.broadcast %cst_9 : f32 to vector<1x128xf32>
    %39 = arith.subf %38, %37 : vector<1x128xf32>
    %40 = arith.mulf %36, %39 : vector<1x128xf32>
    %cst_10 = arith.constant 7.812500e-03 : f32
    %41 = vector.broadcast %cst_10 : f32 to vector<1x128xf32>
    %42 = arith.mulf %40, %41 : vector<1x128xf32>
    %43 = vector.broadcast %42 : vector<1x128xf32> to vector<16x128xf32>
    %44 = arith.mulf %33, %43 : vector<16x128xf32>
    %cst_11 = arith.constant dense<0.000000e+00> : vector<16xf32>
    %45 = vector.multi_reduction <add>, %44, %cst_11 [1] : vector<16x128xf32> to vector<16xf32>
    %46 = vector.shape_cast %45 : vector<16xf32> to vector<16x1xf32>
    %cst_12 = arith.constant 0.000000e+00 : f32
    %47 = vector.broadcast %cst_12 : f32 to vector<16x1xf32>
    %48 = arith.addf %46, %47 : vector<16x1xf32>
    %49 = tpu.reciprocal %48 {approx = true} : vector<16x1xf32> -> vector<16x1xf32>
    %50 = arith.mulf %48, %49 : vector<16x1xf32>
    %cst_13 = arith.constant 2.000000e+00 : f32
    %51 = vector.broadcast %cst_13 : f32 to vector<16x1xf32>
    %52 = arith.subf %51, %50 : vector<16x1xf32>
    %53 = arith.mulf %49, %52 : vector<16x1xf32>
    %cst_14 = arith.constant 6.250000e-02 : f32
    %54 = vector.broadcast %cst_14 : f32 to vector<16x1xf32>
    %55 = arith.mulf %53, %54 : vector<16x1xf32>
    %56 = vector.broadcast %55 : vector<16x1xf32> to vector<16x128xf32>
    %57 = arith.mulf %44, %56 : vector<16x128xf32>
    %cst_15 = arith.constant dense<0.000000e+00> : vector<128xf32>
    %58 = vector.multi_reduction <add>, %57, %cst_15 [0] : vector<16x128xf32> to vector<128xf32>
    %59 = vector.shape_cast %58 : vector<128xf32> to vector<1x128xf32>
    %60 = tpu.reciprocal %59 {approx = true} : vector<1x128xf32> -> vector<1x128xf32>
    %61 = arith.mulf %59, %60 : vector<1x128xf32>
    %cst_16 = arith.constant 2.000000e+00 : f32
    %62 = vector.broadcast %cst_16 : f32 to vector<1x128xf32>
    %63 = arith.subf %62, %61 : vector<1x128xf32>
    %64 = arith.mulf %60, %63 : vector<1x128xf32>
    %cst_17 = arith.constant 7.812500e-03 : f32
    %65 = vector.broadcast %cst_17 : f32 to vector<1x128xf32>
    %66 = arith.mulf %64, %65 : vector<1x128xf32>
    %67 = vector.broadcast %66 : vector<1x128xf32> to vector<16x128xf32>
    %68 = arith.mulf %57, %67 : vector<16x128xf32>
    %cst_18 = arith.constant dense<0.000000e+00> : vector<16xf32>
    %69 = vector.multi_reduction <add>, %68, %cst_18 [1] : vector<16x128xf32> to vector<16xf32>
    %70 = vector.shape_cast %69 : vector<16xf32> to vector<16x1xf32>
    %cst_19 = arith.constant 0.000000e+00 : f32
    %71 = vector.broadcast %cst_19 : f32 to vector<16x1xf32>
    %72 = arith.addf %70, %71 : vector<16x1xf32>
    %73 = tpu.reciprocal %72 {approx = true} : vector<16x1xf32> -> vector<16x1xf32>
    %74 = arith.mulf %72, %73 : vector<16x1xf32>
    %cst_20 = arith.constant 2.000000e+00 : f32
    %75 = vector.broadcast %cst_20 : f32 to vector<16x1xf32>
    %76 = arith.subf %75, %74 : vector<16x1xf32>
    %77 = arith.mulf %73, %76 : vector<16x1xf32>
    %cst_21 = arith.constant 6.250000e-02 : f32
    %78 = vector.broadcast %cst_21 : f32 to vector<16x1xf32>
    %79 = arith.mulf %77, %78 : vector<16x1xf32>
    %80 = vector.broadcast %79 : vector<16x1xf32> to vector<16x128xf32>
    %81 = arith.mulf %68, %80 : vector<16x128xf32>
    %cst_22 = arith.constant dense<0.000000e+00> : vector<128xf32>
    %82 = vector.multi_reduction <add>, %81, %cst_22 [0] : vector<16x128xf32> to vector<128xf32>
    %83 = vector.shape_cast %82 : vector<128xf32> to vector<1x128xf32>
    %84 = vector.extract_strided_slice %81 {offsets = [0, 0], sizes = [16, 8], strides = [1, 1]} : vector<16x128xf32> to vector<16x8xf32>
    %85 = vector.extract_strided_slice %83 {offsets = [0, 0], sizes = [1, 8], strides = [1, 1]} : vector<1x128xf32> to vector<1x8xf32>
    %86 = tpu.reciprocal %85 {approx = true} : vector<1x8xf32> -> vector<1x8xf32>
    %87 = arith.mulf %85, %86 : vector<1x8xf32>
    %cst_23 = arith.constant 2.000000e+00 : f32
    %88 = vector.broadcast %cst_23 : f32 to vector<1x8xf32>
    %89 = arith.subf %88, %87 : vector<1x8xf32>
    %90 = arith.mulf %86, %89 : vector<1x8xf32>
    %91 = vector.broadcast %90 : vector<1x8xf32> to vector<16x8xf32>
    %92 = arith.mulf %84, %91 : vector<16x8xf32>
    %93 = tpu.iota {dimensions = array<i32: 0>} : vector<8x8xi32>
    %94 = tpu.iota {dimensions = array<i32: 1>} : vector<8x8xi32>
    %95 = arith.cmpi eq, %93, %94 : vector<8x8xi32>
    %96 = arith.extui %95 : vector<8x8xi1> to vector<8x8xi32>
    %97 = arith.sitofp %96 : vector<8x8xi32> to vector<8x8xf32>
    %cst_24 = arith.constant dense<0.000000e+00> : vector<8x16xf32>
    %98 = tpu.matmul %97, %92, %cst_24 {dimension_numbers = #tpu.dot_dimension_numbers<[1], [1], [0], [0], [0, 0, 1, 0], [], []>} : vector<8x8xf32>, vector<16x8xf32>, vector<8x16xf32> -> vector<8x16xf32>
    %c0_25 = arith.constant 0 : index
    %c0_26 = arith.constant 0 : index
    %99 = vector.load %arg2[%c0_25, %c0_26] : memref<8x16xf32, #tpu.memory_space<vmem>>, vector<8x16xf32>
    tpu.vector_store %arg2[%c0_25, %c0_26], %98 {strides = array<i32>} : memref<8x16xf32, #tpu.memory_space<vmem>>, vector<8x16xf32>,
    %c0_27 = arith.constant 0 : index
    %c0_28 = arith.constant 0 : index
    %100 = vector.load %arg3[%c0_27, %c0_28] : memref<16x1xf32, #tpu.memory_space<vmem>>, vector<16x1xf32>
    tpu.vector_store %arg3[%c0_27, %c0_28], %72 {strides = array<i32>} : memref<16x1xf32, #tpu.memory_space<vmem>>, vector<16x1xf32>,
    %c0_29 = arith.constant 0 : index
    %c0_30 = arith.constant 0 : index
    %101 = vector.load %arg4[%c0_29, %c0_30] : memref<1x128xf32, #tpu.memory_space<vmem>>, vector<1x128xf32>
    tpu.vector_store %arg4[%c0_29, %c0_30], %83 {strides = array<i32>} : memref<1x128xf32, #tpu.memory_space<vmem>>, vector<1x128xf32>,
    return
  }
  func.func @transform_0(%arg0: i32) -> (i32, i32) {
    %c0_i32 = arith.constant 0 : i32
    %c0_i32_0 = arith.constant 0 : i32
    %c0_i32_1 = arith.constant 0 : i32
    return %c0_i32, %c0_i32_0 : i32, i32
  }
  func.func @transform_1(%arg0: i32) -> (i32, i32) {
    %c0_i32 = arith.constant 0 : i32
    %c0_i32_0 = arith.constant 0 : i32
    %c0_i32_1 = arith.constant 0 : i32
    return %c0_i32, %c0_i32_0 : i32, i32
  }
  func.func @transform_2(%arg0: i32) -> (i32, i32) {
    %c0_i32 = arith.constant 0 : i32
    %c0_i32_0 = arith.constant 0 : i32
    %c0_i32_1 = arith.constant 0 : i32
    return %c0_i32, %c0_i32_0 : i32, i32
  }
  func.func @transform_3(%arg0: i32) -> (i32, i32) {
    %c0_i32 = arith.constant 0 : i32
    %c0_i32_0 = arith.constant 0 : i32
    %c0_i32_1 = arith.constant 0 : i32
    return %c0_i32, %c0_i32_0 : i32, i32
  }
}

</mosaic_0001>

<bundles_post_ra>
// kernel: tpu_custom_call.1
= control target key start
LH: loop header
LB: loop body
LE: loop exit
PB: predicated region body
PF: predicated region fallthrough
CT: control target
= control target key end

     0   :  { %9 = vsyncpa [#allocation3], 0  ;;  %vm40_vm0 = vcmask 130048   ;;  %v29_v3 = vlaneseq  ;;  %v622_v10 = vmov 0.0   ;;  %s773_s0 = inlined_call_operand.vmem [shape: f32[128,16], index: 0, kind: input, shape index: {}]   ;;  %s774_s1 = inlined_call_operand.hbm [shape: f32[8,16], index: 1, kind: output, shape index: {0}]   ;;  %s775_s2 = inlined_call_operand.vmem [shape: f32[16,1], index: 2, kind: output, shape index: {1}]   ;;  %s776_s3 = inlined_call_operand.hbm [shape: f32[1,128], index: 3, kind: output, shape index: {2}]  }
   0x1   :  { %v13_v0 = vld [vmem:[%s773_s0] sm:$0xff]  ;;  %v14_v1 = vld [vmem:[%s773_s0 + $0x8] sm:$0xff]  ;;  %v15_v2 = vld [vmem:[%s773_s0 + $0x10] sm:$0xff] }
   0x2   :  { %v493_v4 = vpack.c.bf16 %v14_v1, %v13_v0  ;;  %vm658_vm1 = vmpackc.low %vm40_vm0, %vm40_vm0  ;;  %v16_v6 = vld [vmem:[%s773_s0 + $0x18] sm:$0xff]  ;;  %v30_v8 = vshrl.u32 %v29_v3, 7  ;;  %v33_v9 = vand.u32 127, %v29_v3 }
   0x3   :  { %v499_v7 = vpack.c.bf16 %v16_v6, %v15_v2 }
   0x4   :  { %495 = vmatprep.subr.msk.bf16.mxu0 %vm658_vm1, %v493_v4  ;;  %vm34_vm2 = vcmp.eq.s32.totalorder %v30_v8, %v33_v9 }
   0x5   :  { %498 = vmatpush3.bf16.xpose.msk.msra.mxu0 %vm658_vm1, %v493_v4  ;;  %v672_v11 = vsel %vm34_vm2, 1.0, %v622_v10 }
   0x6   :  { %501 = vmatprep.subr.msk.bf16.mxu0 %vm658_vm1, %v499_v7 }
   0x7   :  { %10 = vsyncpa [#allocation5], 0  ;;  %v17_v12 = vld [vmem:[%s773_s0 + $0x20] sm:$0xff]  ;;  %v18_v13 = vld [vmem:[%s773_s0 + $0x28] sm:$0xff]  ;;  %483 = vmatprep.mubr.msk.f32.mxu0 %vm40_vm0, %v672_v11  ;;  %v31_v30 = vadd.s32 8, %v30_v8  ;;  %vm624_vm4 = vmmov 0  }
   0x8   :  { %v505_v14 = vpack.c.bf16 %v18_v13, %v17_v12  ;;  %v19_v15 = vld [vmem:[%s773_s0 + $0x30] sm:$0xff]  ;;  %v20_v16 = vld [vmem:[%s773_s0 + $0x38] sm:$0xff]  ;;  %v21_v18 = vld [vmem:[%s773_s0 + $0x40] sm:$0xff]  ;;  %490 = vmatprep.mubr.msk.f32.mxu1 %vm624_vm4, %v622_v10  ;;  %vm371_vm5 = vcmask 7168   ;;  %vm291_vm6 = vcmask 64512  }
   0x9   :  { %v511_v17 = vpack.c.bf16 %v20_v16, %v19_v15  ;;  %v22_v19 = vld [vmem:[%s773_s0 + $0x48] sm:$0xff]  ;;  %v23_v21 = vld [vmem:[%s773_s0 + $0x50] sm:$0xff]  ;;  %v24_v22 = vld [vmem:[%s773_s0 + $0x58] sm:$0xff]  ;;  %vm35_vm3 = vcmp.eq.s32.totalorder %v31_v30, %v33_v9 }
   0xa   :  { %v517_v20 = vpack.c.bf16 %v22_v19, %v21_v18  ;;  %v523_v23 = vpack.c.bf16 %v24_v22, %v23_v21  ;;  %v25_v24 = vld [vmem:[%s773_s0 + $0x60] sm:$0xff]  ;;  %v26_v25 = vld [vmem:[%s773_s0 + $0x68] sm:$0xff]  ;;  %v27_v27 = vld [vmem:[%s773_s0 + $0x70] sm:$0xff]  ;;  %v408_v31 = vsel %vm35_vm3, 1.0, %v622_v10 }
   0xb   :  { %v529_v26 = vpack.c.bf16 %v26_v25, %v25_v24  ;;  %v28_v28 = vld [vmem:[%s773_s0 + $0x78] sm:$0xff]  ;;  %vm543_vm7 = vmpackc.low %vm291_vm6, %vm291_vm6 }
   0xc   :  { %v535_v29 = vpack.c.bf16 %v28_v28, %v27_v27 }
   0xd   :  { %504 = vmatpush3.bf16.xpose.msk.msra.mxu0 %vm658_vm1, %v499_v7 }
   0xe   :  { %507 = vmatprep.subr.msk.bf16.mxu0 %vm658_vm1, %v505_v14 }
  0x15   :  { %510 = vmatpush3.bf16.xpose.msk.msra.mxu0 %vm658_vm1, %v505_v14 }
  0x16   :  { %513 = vmatprep.subr.msk.bf16.mxu0 %vm658_vm1, %v511_v17 }
  0x1d   :  { %516 = vmatpush3.bf16.xpose.msk.msra.mxu0 %vm658_vm1, %v511_v17 }
  0x1e   :  { %519 = vmatprep.subr.msk.bf16.mxu0 %vm658_vm1, %v517_v20 }
  0x25   :  { %522 = vmatpush3.bf16.xpose.msk.msra.mxu0 %vm658_vm1, %v517_v20 }
  0x26   :  { %525 = vmatprep.subr.msk.bf16.mxu0 %vm658_vm1, %v523_v23 }
  0x2d   :  { %528 = vmatpush3.bf16.xpose.msk.msra.mxu0 %vm658_vm1, %v523_v23 }
  0x2e   :  { %531 = vmatprep.subr.msk.bf16.mxu0 %vm658_vm1, %v529_v26 }
  0x35   :  { %534 = vmatpush3.bf16.xpose.msk.msra.mxu0 %vm658_vm1, %v529_v26 }
  0x36   :  { %537 = vmatprep.subr.msk.bf16.mxu0 %vm658_vm1, %v535_v29 }
  0x3d   :  { %540 = vmatpush3.bf16.xpose.msk.msra.mxu0 %vm658_vm1, %v535_v29 }
  0x44   :  { %484 = vmatmul.mubr.msk.f32.vlgmr.msra.gmra.mrb[0].mxu0 %vm40_vm0, %v408_v31 }
 0x117   :  { %v485_v32 = vpop.f32.mrb[0].mxu0 }
 0x118   :  { %v171_v33 = vmul.f32 20.0, %v485_v32  ;;  %v161_v34 = vpop.f32.mrb[1].mxu0 }
 0x119   :  { %v170_v35 = vmul.f32 20.0, %v161_v34 }
 0x11b   :  { %v172_v36 = vmax.f32 %v170_v35, %v171_v33 }
 0x11d   :  { %v173_v37 = vrot.slane %v172_v36, 4 }
 0x11f   :  { %v174_v38 = vmax.f32 %v172_v36, %v173_v37 }
 0x121   :  { %v175_v39 = vrot.slane %v174_v38, 2 }
 0x123   :  { %v176_v40 = vmax.f32 %v174_v38, %v175_v39 }
 0x125   :  { %v177_v41 = vrot.slane %v176_v40, 1 }
 0x127   :  { %v178_v42 = vmax.f32 %v176_v40, %v177_v41 }
 0x129   :  { %v179_v43 = vsub.f32 %v170_v35, %v178_v42  ;;  %v180_v44 = vsub.f32 %v171_v33, %v178_v42 }
 0x12b   :  { %v181_v45 = vmul.f32 1.442695, %v179_v43  ;;  %v183_v46 = vmul.f32 1.442695, %v180_v44 }
 0x12d   :  { %550 = vpow2.f32 %v181_v45 }
 0x12e   :  { %552 = vpow2.f32 %v183_v46 }
 0x137   :  { %v551_v47 = vpop.eup %550 }
 0x138   :  { %v553_v48 = vpop.eup %552 }
 0x139   :  { %v185_v49 = vadd.f32 %v553_v48, %v551_v47 }
 0x13b   :  { %v186_v50 = vrot.slane %v185_v49, 4 }
 0x13d   :  { %v187_v51 = vadd.f32 %v186_v50, %v185_v49 }
 0x13f   :  { %v188_v52 = vrot.slane %v187_v51, 2 }
 0x141   :  { %v189_v53 = vadd.f32 %v188_v52, %v187_v51 }
 0x143   :  { %v190_v54 = vrot.slane %v189_v53, 1 }
 0x145   :  { %v191_v55 = vadd.f32 %v190_v54, %v189_v53 }
 0x147   :  { %554 = vrcp.f32 %v191_v55 }
 0x151   :  { %v555_v56 = vpop.eup %554 }
 0x152   :  { %v193_v57 = vmul.f32 %v555_v56, %v191_v55 }
 0x154   :  { %v194_v58 = vsub.f32 2.0, %v193_v57 }
 0x156   :  { %v195_v59 = vmul.f32 %v555_v56, %v194_v58  ;;  %v623_v56 = vmov 0.0|0.0  }
 0x157   :  { %541 = vmatprep.subr.bf16.mxu1 %v623_v56 }
 0x158   :  { %v196_v60 = vmul.f32 %v551_v47, %v195_v59  ;;  %v197_v61 = vmul.f32 %v553_v48, %v195_v59 }
 0x15a   :  { %198 = vadd.xlane.f32.xlu0 %v196_v60 }
 0x15e   :  { %200 = vadd.xlane.f32.xlu0 %v197_v61 }
 0x1e7   :  { %v199_v62 = vpop.xlane.xlu0 %198 }
 0x1e8   :  { %556 = vrcp.f32 %v199_v62 }
 0x1eb   :  { %v201_v63 = vpop.xlane.xlu0 %200 }
 0x1ec   :  { %558 = vrcp.f32 %v201_v63 }
 0x1f2   :  { %v557_v0 = vpop.eup %556 }
 0x1f3   :  { %v204_v1 = vmul.f32 %v557_v0, %v199_v62 }
 0x1f5   :  { %v206_v2 = vsub.f32 2.0, %v204_v1 }
 0x1f6   :  { %v559_v3 = vpop.eup %558 }
 0x1f7   :  { %v208_v4 = vmul.f32 %v557_v0, %v206_v2  ;;  %v205_v5 = vmul.f32 %v559_v3, %v201_v63 }
 0x1f9   :  { %v207_v6 = vsub.f32 2.0, %v205_v5  ;;  %v210_v7 = vmul.f32 0.0625, %v208_v4 }
 0x1fb   :  { %v209_v8 = vmul.f32 %v559_v3, %v207_v6  ;;  %v212_v13 = vmul.f32 %v210_v7, %v196_v60 }
 0x1fd   :  { %v211_v9 = vmul.f32 0.0625, %v209_v8 }
 0x1ff   :  { %v213_v12 = vmul.f32 %v211_v9, %v197_v61 }
 0x201   :  { %v214_v14 = vadd.f32 %v213_v12, %v212_v13 }
 0x203   :  { %v215_v15 = vrot.slane %v214_v14, 4 }
 0x205   :  { %v216_v16 = vadd.f32 %v215_v15, %v214_v14 }
 0x207   :  { %v217_v17 = vrot.slane %v216_v16, 2 }
 0x209   :  { %v218_v18 = vadd.f32 %v217_v17, %v216_v16 }
 0x20b   :  { %v219_v19 = vrot.slane %v218_v18, 1 }
 0x20d   :  { %v220_v20 = vadd.f32 %v219_v19, %v218_v18 }
 0x20f   :  { %560 = vrcp.f32 %v220_v20 }
 0x219   :  { %v561_v21 = vpop.eup %560 }
 0x21a   :  { %v222_v22 = vmul.f32 %v561_v21, %v220_v20 }
 0x21c   :  { %v223_v23 = vsub.f32 2.0, %v222_v22 }
 0x21e   :  { %v224_v24 = vmul.f32 %v561_v21, %v223_v23 }
 0x220   :  { %v225_v25 = vmul.f32 0.0078125, %v224_v24 }
 0x222   :  { %v226_v26 = vmul.f32 %v225_v25, %v212_v13  ;;  %v227_v27 = vmul.f32 %v225_v25, %v213_v12 }
 0x224   :  { %228 = vadd.xlane.f32.xlu1 %v226_v26 }
 0x228   :  { %230 = vadd.xlane.f32.xlu1 %v227_v27 }
 0x2b1   :  { %v229_v28 = vpop.xlane.xlu1 %228 }
 0x2b2   :  { %562 = vrcp.f32 %v229_v28 }
 0x2b5   :  { %v231_v29 = vpop.xlane.xlu1 %230 }
 0x2b6   :  { %564 = vrcp.f32 %v231_v29 }
 0x2bc   :  { %v563_v30 = vpop.eup %562 }
 0x2bd   :  { %v236_v31 = vmul.f32 %v563_v30, %v229_v28 }
 0x2bf   :  { %v238_v32 = vsub.f32 2.0, %v236_v31 }
 0x2c0   :  { %v565_v33 = vpop.eup %564 }
 0x2c1   :  { %v240_v34 = vmul.f32 %v563_v30, %v238_v32  ;;  %v237_v35 = vmul.f32 %v565_v33, %v231_v29 }
 0x2c3   :  { %v239_v36 = vsub.f32 2.0, %v237_v35  ;;  %v242_v37 = vmul.f32 0.0625, %v240_v34 }
 0x2c5   :  { %v241_v38 = vmul.f32 %v565_v33, %v239_v36  ;;  %v244_v40 = vmul.f32 %v242_v37, %v226_v26 }
 0x2c7   :  { %v243_v39 = vmul.f32 0.0625, %v241_v38 }
 0x2c9   :  { %v245_v41 = vmul.f32 %v243_v39, %v227_v27 }
 0x2cb   :  { %v246_v42 = vadd.f32 %v245_v41, %v244_v40 }
 0x2cd   :  { %v247_v43 = vrot.slane %v246_v42, 4 }
 0x2cf   :  { %v248_v44 = vadd.f32 %v247_v43, %v246_v42 }
 0x2d1   :  { %v249_v45 = vrot.slane %v248_v44, 2 }
 0x2d3   :  { %v250_v46 = vadd.f32 %v249_v45, %v248_v44 }
 0x2d5   :  { %v251_v47 = vrot.slane %v250_v46, 1 }
 0x2d7   :  { %v252_v48 = vadd.f32 %v251_v47, %v250_v46 }
 0x2d9   :  { %566 = vrcp.f32 %v252_v48 }
 0x2e3   :  { %v567_v49 = vpop.eup %566 }
 0x2e4   :  { %v254_v50 = vmul.f32 %v567_v49, %v252_v48 }
 0x2e6   :  { %v255_v51 = vsub.f32 2.0, %v254_v50 }
 0x2e8   :  { %v256_v52 = vmul.f32 %v567_v49, %v255_v51 }
 0x2ea   :  { %v257_v53 = vmul.f32 0.0078125, %v256_v52 }
 0x2ec   :  { %v259_v54 = vmul.f32 %v257_v53, %v245_v41  ;;  %v258_v55 = vmul.f32 %v257_v53, %v244_v40 }
 0x2ee   :  { %262 = vadd.xlane.f32.xlu1 %v259_v54  ;;  %260 = vadd.xlane.f32.xlu0 %v258_v55 }
 0x37b   :  { %v263_v57 = vpop.xlane.xlu1 %262  ;;  %v261_v58 = vpop.xlane.xlu0 %260 }
 0x37c   :  { %568 = vrcp.f32 %v263_v57  ;;  %373 = vst.msk [vmem:[%s775_s2 + $0x8] sm:$0xff] %vm371_vm5, %v263_v57  ;;  %372 = vst.msk [vmem:[%s775_s2] sm:$0xff] %vm371_vm5, %v261_v58  ;;  %s625_s2 = smov [#allocation4]  }
 0x37d   :  { %570 = vrcp.f32 %v261_v58  ;;  %s393_s20 = sshll.u32 %s625_s2, 4  ;;  %s394_s20 = int_to_ptr.vmem [resolvable:$true] %s393_s20 }
 0x37e   :  { %s574_s21 = scalar_lea.vmem %s394_s20, 16  ;;  %s578_s22 = scalar_lea.vmem %s394_s20, 32 }
 0x37f   :  { %p575_p0 = scmp.ne.s32.totalorder %s394_s20, %s574_s21  ;;  %p579_p1 = scmp.lt.s32.totalorder %s394_s20, %s394_s20 }
 0x380   :  { %p580_p2 = scmp.lt.s32.totalorder %s578_s22, %s574_s21 }
 0x382   :  { %p581_p3 = por %p580_p2, %p579_p1 }
 0x384   :  { %p582_p4 = pnand %p581_p3, %p575_p0 }
 0x386   :  { %v569_v59 = vpop.eup %568 }
 0x387   :  { %v571_v60 = vpop.eup %570  ;;  %v269_v61 = vmul.f32 %v569_v59, %v263_v57 }
 0x388   :  { %v268_v62 = vmul.f32 %v571_v60, %v261_v58 }
 0x389   :  { %v271_v63 = vsub.f32 2.0, %v269_v61 }
 0x38a   :  { %v270_v0 = vsub.f32 2.0, %v268_v62 }
 0x38b   :  { %v273_v10 = vmul.f32 %v569_v59, %v271_v63 }
 0x38c   :  { %v272_v1 = vmul.f32 %v571_v60, %v270_v0 }
 0x38d   :  { %v275_v2 = vmul.f32 0.0625, %v273_v10 }
 0x38e   :  { %v274_v3 = vmul.f32 0.0625, %v272_v1 }
 0x38f   :  { %v277_v4 = vmul.f32 %v275_v2, %v259_v54 }
 0x390   :  { %v276_v5 = vmul.f32 %v274_v3, %v258_v55 }
 0x392   :  { %v278_v6 = vadd.f32 %v277_v4, %v276_v5 }
 0x394   :  { %v279_v7 = vrot.slane %v278_v6, 4 }
 0x396   :  { %v280_v8 = vadd.f32 %v279_v7, %v278_v6 }
 0x398   :  { %v281_v9 = vrot.slane %v280_v8, 2 }
 0x39a   :  { %v282_v12 = vadd.f32 %v281_v9, %v280_v8 }
 0x39c   :  { %v283_v13 = vrot.slane %v282_v12, 1 }
 0x39e   :  { %v284_v14 = vadd.f32 %v283_v13, %v282_v12 }
 0x3a0   :  { %374 = vst [vmem:[#allocation4] sm:$0x1] %v284_v14  ;;  %572 = vrcp.f32 %v284_v14 }
 0x3aa   :  { %v573_v15 = vpop.eup %572 }
 0x3ab   :  { %v286_v16 = vmul.f32 %v573_v15, %v284_v14 }
 0x3ad   :  { %v287_v17 = vsub.f32 2.0, %v286_v16 }
 0x3af   :  { %v288_v18 = vmul.f32 %v573_v15, %v287_v17 }
 0x3b1   :  { %v289_v19 = vmul.f32 %v288_v18, %v276_v5  ;;  %v290_v20 = vmul.f32 %v288_v18, %v277_v4 }
 0x3b3   :  { %v542_v21 = vpack.c.bf16 %v290_v20, %v289_v19 }
 0x3b5   :  { %544 = vmatpush3.bf16.xpose.msk.msra.mxu1 %vm543_vm7, %v542_v21 }
 0x3bc   :  { %491 = vmatmul.mubr.msk.f32.vlgmr.msra.gmra.mrb[0].mxu1 %vm291_vm6, %v672_v11 }
 0x3bd   :  { %585 = shalt.err (!%p582_p4)
}
 0x3be   :  { %s586_s25 = scalar_lea.hbm %s776_s3, 16 }
 0x3bf   :  { %p587_p5 = scmp.ne.s32.totalorder %s776_s3, %s586_s25  ;;  %p590_p6 = scmp.lt.u32.totalorder %s586_s25, %s776_s3 }
 0x3c1   :  { %p592_p7 = pnand %p590_p6, %p587_p5 }
 0x3c3   :  { %595 = shalt.err (!%p592_p7)
}
 0x3c4   :  { %396 = dma.vmem_to_hbm [thread:$0]  %s394_s20, 16, %s776_s3, [#allocation5]  }
 0x3c5   :  { %s626_s5 = smov [#allocation2]  }
 0x3c6   :  { %s381_s6 = sshll.u32 %s626_s5, 4  ;;  %s382_s6 = int_to_ptr.vmem [resolvable:$true] %s381_s6 }
 0x3c7   :  { %s596_s7 = scalar_lea.vmem %s382_s6, 128  ;;  %p601_p9 = scmp.lt.s32.totalorder %s382_s6, %s382_s6 }
 0x3c8   :  { %p597_p8 = scmp.ne.s32.totalorder %s382_s6, %s596_s7  ;;  %p602_p10 = scmp.lt.s32.totalorder %s596_s7, %s596_s7 }
 0x3ca   :  { %p603_p11 = por %p602_p10, %p601_p9 }
 0x3cc   :  { %p604_p12 = pnand %p603_p11, %p597_p8 }
 0x48f   :  { %v366_v11 = vpop.f32.mrb[0].mxu1 }
 0x490   :  { %370 = vst.msk [vmem:[#allocation2] sm:$0xff] %vm40_vm0, %v366_v11  ;;  %v492_v22 = vpop.f32.mrb[1].mxu1 }
 0x491   :  { %607 = shalt.err (!%p604_p12)
}
 0x492   :  { %s608_s10 = scalar_lea.hbm %s774_s1, 128 }
 0x493   :  { %p609_p13 = scmp.ne.s32.totalorder %s774_s1, %s608_s10  ;;  %p612_p0 = scmp.lt.u32.totalorder %s608_s10, %s774_s1 }
 0x495   :  { %p614_p1 = pnand %p612_p0, %p609_p13 }
 0x497   :  { %617 = shalt.err (!%p614_p1)
}
 0x498   :  { %384 = dma.vmem_to_hbm [thread:$0]  %s382_s6, 128, %s774_s1, [#allocation3]  }
 0x499   :  { %618 = dma.done.wait [#allocation3], 128  }
 0x49a   :  { %619 = vsyncadd [#allocation3], 4294967168 }
 0x49b   :  { %620 = dma.done.wait [#allocation5], 16  }
 0x49c   :  { %621 = vsyncadd [#allocation5], 4294967280 }
 0x49d   :  { %405 = vsyncpa [#allocation3], 1 }
 0x49e   :  { %406 = vsyncpa [#allocation5], 1 }

</bundles_post_ra>
